<compile_context>
chip_gen: v6e
topology: v6e:2x2x1
jax: 0.10.0
libtpu: 0.0.40
codegen_flags: <defaults>
</compile_context>

<pallas_src>
import jax
import jax.numpy as jnp
from jax.experimental import pallas as pl
from jax.experimental.pallas import tpu as pltpu

_LANE = 128


def _make_scale_kernel(compute_f32):
    def kernel(scale_ref, x_ref, o_ref):
        s = scale_ref[0]                        # f32 scalar from SMEM
        x = x_ref[...]
        if compute_f32:
            o_ref[...] = (x.astype(jnp.float32) * s).astype(o_ref.dtype)
        else:
            o_ref[...] = x * s.astype(x.dtype)  # native bf16/f16 VALU path (v6e/v7x)
    return kernel


def _tpu_generation():
    try:
        kind = jax.devices()[0].device_kind.lower()
    except Exception:
        return 6
    for g in (7, 6, 5, 4, 3, 2):
        if f"v{g}" in kind:
            return g
    return 6


def _choose_cols(n):
    """Widest lane-dense last dim (multiple of 128) dividing n; 0 if ragged."""
    for c in (1024, 512, 256, _LANE):
        if n >= c and n % c == 0:
            return c
    return 0


def _round_up(x, m):
    return (x + m - 1) // m * m


def _choose_tile_rows(rows, cols, itemsize, target_bytes, two_cores):
    """Rows per block: ~target_bytes blocks, sublane-aligned, never tiny."""
    sub = {4: 8, 2: 16, 1: 32}.get(itemsize, 8)
    if rows <= sub:
        return rows  # one short block spanning the full (small) row dim — valid
    max_tm = max(sub, (target_bytes // (cols * itemsize)) // sub * sub)
    max_tm = min(max_tm, (rows // sub) * sub)
    # Prefer an exact divisor (no masked edge block), but only if it keeps the block
    # >= ~max_tm/2 — never fall through to a sublane-sized tile + huge grid.
    lo = max(sub, (max_tm // 2) // sub * sub)
    best_any, best_even = 0, 0
    for cand in range(max_tm, lo - 1, -sub):
        if rows % cand == 0:
            if best_any == 0:
                best_any = cand
            if (rows // cand) % 2 == 0:   # even step count balances 2 TensorCores
                best_even = cand
                break
    if two_cores and best_even:
        tm = best_even
    elif best_any:
        tm = best_any
    else:
        tm = max_tm                        # Pallas masks the single partial edge block
    # v7x megacore: make sure both TensorCores get at least one grid step.
    if two_cores and pl.cdiv(rows, tm) < 2 and rows >= 2 * sub:
        tm = min(tm, _round_up((rows + 1) // 2, sub))
    return tm


def single_output_transform(outputs, scaling, *, donate_input=False):
    """Pallas equivalent of SingleOutputTransform.forward: outputs * scaling."""
    orig_shape = outputs.shape
    orig_dtype = outputs.dtype
    n = outputs.size
    if n == 0:
        return outputs

    itemsize = jnp.dtype(orig_dtype).itemsize
    gen = _tpu_generation()
    two_cores = gen >= 7                                   # v7x: 2 TensorCores/chip
    target_bytes = (4 << 20) if gen >= 6 else (2 << 20)    # v5e: 16 MiB scoped VMEM

    # TODO(synk): integer / float64 inputs follow torch type-promotion (int * float
    # -> float32, f64 stays f64); here they are computed in f32 and cast back.
    native_ok = (jnp.issubdtype(orig_dtype, jnp.floating)
                 and itemsize <= 2 and gen >= 6)
    kernel = _make_scale_kernel(compute_f32=not native_ok)

    scale_arr = jnp.asarray([scaling], dtype=jnp.float32)
    cost = pl.CostEstimate(flops=n, transcendentals=0,
                           bytes_accessed=2 * n * itemsize)
    io_alias = {1: 0} if donate_input else {}   # operand 1 = tensor -> output 0
    smem_spec = pl.BlockSpec(memory_space=pltpu.MemorySpace.SMEM)
    cparams = pltpu.CompilerParams(dimension_semantics=("parallel",))

    cols = _choose_cols(n)
    if cols:
        # Lane-dense 2-D slab: metadata-only reshape, contiguous (tm, cols) tiles.
        rows = n // cols
        x2d = outputs.reshape(rows, cols)
        tm = _choose_tile_rows(rows, cols, itemsize, target_bytes, two_cores)
        out = pl.pallas_call(
            kernel,
            out_shape=jax.ShapeDtypeStruct((rows, cols), orig_dtype),
            grid_spec=pltpu.PrefetchScalarGridSpec(
                num_scalar_prefetch=0,
                grid=(pl.cdiv(rows, tm),),
                in_specs=[smem_spec,
                          pl.BlockSpec((tm, cols), lambda i: (i, 0))],
                out_specs=pl.BlockSpec((tm, cols), lambda i: (i, 0)),
            ),
            compiler_params=cparams,
            cost_estimate=cost,
            input_output_aliases=io_alias,
        )(scale_arr, x2d)
        return out.reshape(orig_shape)

    # Ragged element count: stream the flat array through 128-aligned 1-D blocks;
    # Pallas masks the partial edge block (no pad / slice -> still 1 read + 1 write).
    flat = outputs.reshape(-1)
    if n <= _LANE:
        blk = n                                   # single full-extent block
    else:
        blk = min(_round_up(n, _LANE),
                  max(_LANE, (target_bytes // itemsize) // _LANE * _LANE))
        if two_cores and pl.cdiv(n, blk) < 2:
            blk = _round_up((n + 1) // 2, _LANE)  # >= 2 steps so both cores work
    out = pl.pallas_call(
        kernel,
        out_shape=jax.ShapeDtypeStruct((n,), orig_dtype),
        grid_spec=pltpu.PrefetchScalarGridSpec(
            num_scalar_prefetch=0,
            grid=(pl.cdiv(n, blk),),
            in_specs=[smem_spec,
                      pl.BlockSpec((blk,), lambda i: (i,))],
            out_specs=pl.BlockSpec((blk,), lambda i: (i,)),
        ),
        compiler_params=cparams,
        cost_estimate=cost,
        input_output_aliases=io_alias,
    )(scale_arr, flat)
    return out.reshape(orig_shape)


if __name__ == "__main__":
    key = jax.random.PRNGKey(0)
    extra_params = {"scaling": 2.5}

    # Primary case: small NCHW activation tensor (lane-dense 2-D slab path).
    x = jax.random.normal(key, (2, 4, 16, 16), dtype=jnp.float32)
    out = jax.block_until_ready(single_output_transform(x, extra_params["scaling"]))
    ref = x * extra_params["scaling"]
    assert out.shape == x.shape and out.dtype == x.dtype
    assert jnp.allclose(out, ref, rtol=1e-6, atol=1e-6)

    # Ragged case: element count not a multiple of 128 (masked-tail 1-D path).
    y = jax.random.normal(jax.random.PRNGKey(1), (7, 37), dtype=jnp.float32)
    out_y = jax.block_until_ready(single_output_transform(y, extra_params["scaling"]))
    assert out_y.shape == y.shape and out_y.dtype == y.dtype
    assert jnp.allclose(out_y, y * extra_params["scaling"], rtol=1e-6, atol=1e-6)

    print("KERNEL_OK")
</pallas_src>

<mosaic_0001>
module attributes {stable_mosaic.version = 11 : i64} {
  func.func @kernel(%arg0: i32, %arg1: memref<1xf32, #tpu.memory_space<smem>>, %arg2: memref<2x1024xf32, #tpu.memory_space<vmem>>, %arg3: memref<2x1024xf32, #tpu.memory_space<vmem>>) attributes {dimension_semantics = [#tpu.dimension_semantics<parallel>], iteration_bounds = array<i64: 1>, scalar_prefetch = 0 : i64, scratch_operands = 0 : i64, tpu.core_type = #tpu.core_type<tc>, window_params = [{transform_indices = @transform_0, window_bounds = array<i64: 1>}, {transform_indices = @transform_1, window_bounds = array<i64: 2, 1024>}, {transform_indices = @transform_2, window_bounds = array<i64: 2, 1024>}]} {
    %c0 = arith.constant 0 : index
    %0 = memref.load %arg1[%c0] : memref<1xf32, #tpu.memory_space<smem>>
    %c0_0 = arith.constant 0 : index
    %c0_1 = arith.constant 0 : index
    %1 = vector.load %arg2[%c0_0, %c0_1] : memref<2x1024xf32, #tpu.memory_space<vmem>>, vector<2x1024xf32>
    %2 = vector.broadcast %0 : f32 to vector<2x1024xf32>
    %3 = arith.mulf %1, %2 : vector<2x1024xf32>
    %c0_2 = arith.constant 0 : index
    %c0_3 = arith.constant 0 : index
    %4 = vector.load %arg3[%c0_2, %c0_3] : memref<2x1024xf32, #tpu.memory_space<vmem>>, vector<2x1024xf32>
    tpu.vector_store %arg3[%c0_2, %c0_3], %3 {strides = array<i32>} : memref<2x1024xf32, #tpu.memory_space<vmem>>, vector<2x1024xf32>,
    return
  }
  func.func @transform_0(%arg0: i32) -> i32 {
    %c0_i32 = arith.constant 0 : i32
    %c0_i32_0 = arith.constant 0 : i32
    return %c0_i32 : i32
  }
  func.func @transform_1(%arg0: i32) -> (i32, i32) {
    %c0_i32 = arith.constant 0 : i32
    %c0_i32_0 = arith.constant 0 : i32
    return %arg0, %c0_i32 : i32, i32
  }
  func.func @transform_2(%arg0: i32) -> (i32, i32) {
    %c0_i32 = arith.constant 0 : i32
    %c0_i32_0 = arith.constant 0 : i32
    return %arg0, %c0_i32 : i32, i32
  }
}

</mosaic_0001>

<bundles_post_ra>
// kernel: tpu_custom_call.1
= control target key start
LH: loop header
LB: loop body
LE: loop exit
PB: predicated region body
PF: predicated region fallthrough
CT: control target
= control target key end

     0   :  { %8 = vsyncpa [#allocation4], 0  ;;  %s120_s0 = inlined_call_operand.<no memory space> [shape: f32[1], index: 0, kind: input, shape index: {}]   ;;  %s121_s1 = inlined_call_operand.hbm [shape: f32[2,1024], index: 1, kind: input, shape index: {}]   ;;  %s122_s2 = inlined_call_operand.hbm [shape: f32[2,1024], index: 2, kind: output, shape index: {}]  }
   0x1   :  { %9 = vsyncpa [#allocation5], 0  ;;  %s94_s9 = smov [#allocation3]  }
   0x2   :  { %s18_s10 = sshll.u32 %s94_s9, 4  ;;  %s19_s10 = int_to_ptr.vmem [resolvable:$true] %s18_s10 }
   0x3   :  { %s58_s11 = scalar_lea.vmem %s19_s10, 256  ;;  %p63_p1 = scmp.lt.s32.totalorder %s19_s10, %s19_s10 }
   0x4   :  { %p59_p0 = scmp.ne.s32.totalorder %s19_s10, %s58_s11  ;;  %p64_p2 = scmp.lt.s32.totalorder %s58_s11, %s58_s11 }
   0x6   :  { %p65_p3 = por %p64_p2, %p63_p1 }
   0x8   :  { %p66_p4 = pnand %p65_p3, %p59_p0 }
   0xa   :  { %69 = shalt.err (!%p66_p4)
}
   0xb   :  { %21 = dma.hbm_to_vmem [thread:$0]  %s121_s1, 256, %s19_s10, [#allocation4]  }
   0xc   :  { %90 = dma.done.wait [#allocation4], 256  }
   0xd   :  { %91 = vsyncadd [#allocation4], 4294967040  ;;  %v28_v0 = vstv %s120_s0  ;;  %s95_s16 = smov [#allocation6]   ;;  %v26_v1 = vld [vmem:[#allocation3] sm:$0xff]  ;;  %v27_v2 = vld [vmem:[#allocation3 + $0x8] sm:$0xff] }
   0xe   :  { %s39_s17 = sshll.u32 %s95_s16, 4  ;;  %v29_v3 = vmul.f32 %v28_v0, %v26_v1  ;;  %v30_v4 = vmul.f32 %v28_v0, %v27_v2  ;;  %s40_s17 = int_to_ptr.vmem [resolvable:$true] %s39_s17 }
   0xf   :  { %s70_s18 = scalar_lea.vmem %s40_s17, 256  ;;  %p75_p6 = scmp.lt.s32.totalorder %s40_s17, %s40_s17 }
  0x10   :  { %31 = vst [vmem:[#allocation6] sm:$0xff] %v29_v3  ;;  %32 = vst [vmem:[#allocation6 + $0x8] sm:$0xff] %v30_v4  ;;  %p71_p5 = scmp.ne.s32.totalorder %s40_s17, %s70_s18  ;;  %p76_p7 = scmp.lt.s32.totalorder %s70_s18, %s70_s18 }
  0x12   :  { %p77_p8 = por %p76_p7, %p75_p6 }
  0x14   :  { %p78_p9 = pnand %p77_p8, %p71_p5 }
  0x16   :  { %81 = shalt.err (!%p78_p9)
}
  0x17   :  { %42 = dma.vmem_to_hbm [thread:$0]  %s40_s17, 256, %s122_s2, [#allocation5]  }
  0x18   :  { %92 = dma.done.wait [#allocation5], 256  }
  0x19   :  { %93 = vsyncadd [#allocation5], 4294967040 }
  0x1a   :  { %46 = vsyncpa [#allocation4], 1 }
  0x1b   :  { %47 = vsyncpa [#allocation5], 1 }

</bundles_post_ra>
